<compile_context>
chip_gen: v6e
topology: v6e:2x2x1
jax: 0.10.0
libtpu: 0.0.40
codegen_flags: <defaults>
</compile_context>

<pallas_src>
from functools import partial

import jax
import jax.numpy as jnp
from jax import lax
from jax.experimental import pallas as pl
from jax.experimental.pallas import tpu as pltpu


_TN = (((0,), (0,)), ((), ()))   # contract axis 0 of both operands
_NT = (((1,), (1,)), ((), ()))   # contract axis 1 of both operands


def _phase1_kernel(vals_ref, ridx_ref, cidx_ref, w_ref, b_ref,
                   roww_ref, colw_ref, beff_ref, acc_ref):
    """Accumulate row/col/global sums+counts; emit weight-premultiplied pool tables."""
    R = roww_ref.shape[0]
    C = colw_ref.shape[0]
    Dp1, T = vals_ref.shape
    D = Dp1 - 1
    S = R + C + 1

    @pl.when(pl.program_id(0) == 0)
    def _():
        acc_ref[...] = jnp.zeros_like(acc_ref)

    vals = vals_ref[...]                    # (D+1, T) feature-major; row D = 1.0 for real nnz
    ridx = ridx_ref[...]                    # (1, T) int32, -1 for padding
    cidx = cidx_ref[...]                    # (1, T)

    # Combined one-hot: sublane s matches the row id for s in [0, R), the col id (+R) for
    # s in [R, R+C), and s == S-1 is the global-sum row.  Padded nonzeros have all-zero
    # values (incl. the ones row), so whatever they "match" contributes nothing.
    s = lax.broadcasted_iota(jnp.int32, (S, T), 0)
    sel = (s == ridx) | (s == (cidx + R)) | (s == (S - 1))
    oh = sel.astype(jnp.float32)            # (S, T)

    # One segment-sum matmul per tile, with S on the MXU lane (N) axis:
    #   acc (D+1, S): sums in rows [0, D), counts in row D.
    acc_ref[...] += lax.dot_general(vals, oh, _NT, preferred_element_type=jnp.float32)

    @pl.when(pl.program_id(0) == pl.num_programs(0) - 1)
    def _():
        acc = acc_ref[...]                                   # (D+1, S)
        means = acc[:D] / jnp.maximum(acc[D:D + 1], 1.0)     # (D, S)
        row_mean = means[:, 0:R]                             # per-row mean   (D, R)
        col_mean = means[:, R:R + C]                         # per-col mean   (D, C)
        g_mean = means[:, R + C:S]                           # global mean    (D, 1)
        w = w_ref[...]                                       # (4D, OUT_pad) == weight.T
        # Pre-multiply pool tables by their weight slabs; fold global-mean term into bias.
        colw_ref[...] = lax.dot_general(col_mean, w[1 * D:2 * D], _TN,
                                        preferred_element_type=jnp.float32)
        roww_ref[...] = lax.dot_general(row_mean, w[2 * D:3 * D], _TN,
                                        preferred_element_type=jnp.float32)
        beff_ref[...] = b_ref[...] + lax.dot_general(g_mean, w[3 * D:4 * D], _TN,
                                                     preferred_element_type=jnp.float32)


def _phase2_kernel(vals_ref, ridx_ref, cidx_ref, w0_ref, roww_ref, colw_ref, beff_ref,
                   out_ref):
    """Per-tile: values matmul + gather of premultiplied pool tables + bias + leaky_relu."""
    R = roww_ref.shape[0]
    C = colw_ref.shape[0]
    T = vals_ref.shape[1]

    vals = vals_ref[...]                                             # (D+1, T)
    out = lax.dot_general(vals, w0_ref[...], _TN,
                          preferred_element_type=jnp.float32)        # (T, OUT_pad)

    ridx = ridx_ref[...]                                             # (1, T)
    cidx = cidx_ref[...]
    roh = (lax.broadcasted_iota(jnp.int32, (R, T), 0) == ridx).astype(jnp.float32)
    coh = (lax.broadcasted_iota(jnp.int32, (C, T), 0) == cidx).astype(jnp.float32)

    # Gather-back of the weight-premultiplied pool tables as TN dots (contract the
    # row/col-id axis of both operands) — no explicit transposes through the XLU.
    # TODO(synk): a true dynamic row gather would drop O(T*(R+C)*OUT) MXU work to
    # O(T*OUT) data movement for large R+C; kept as one-hot matmul for guaranteed
    # Mosaic lowering.
    out = out + lax.dot_general(roh, roww_ref[...], _TN, preferred_element_type=jnp.float32)
    out = out + lax.dot_general(coh, colw_ref[...], _TN, preferred_element_type=jnp.float32)
    out = out + beff_ref[...]

    out_ref[...] = jnp.where(out > 0, out, 0.01 * out)               # leaky_relu(0.01)


def _rup(x, m):
    return ((x + m - 1) // m) * m


def _vmem_limit(est_bytes):
    return int(min(100 * 2 ** 20, max(32 * 2 ** 20, 2 * est_bytes)))


@partial(jax.jit, static_argnames=("n_rows", "n_cols", "tile_nnz"))
def exchangeable_forward(values, row_idx, col_idx, w_t, b, *, n_rows, n_cols,
                         tile_nnz=1024):
    nnz, d = values.shape
    out_dim = w_t.shape[1]

    # Lane-dense output width (unmasked 128-lane stores in the kernel).
    out_pad = _rup(out_dim, 128)
    w_p = jnp.pad(w_t.astype(jnp.float32), ((0, 0), (0, out_pad - out_dim)))
    b_p = jnp.pad(b.astype(jnp.float32).reshape(1, -1), ((0, 0), (0, out_pad - out_dim)))
    # Weight slab for the raw values, with an extra zero row so the appended ones row of
    # vals_t contributes nothing.
    w0_ext = jnp.concatenate([w_p[:d], jnp.zeros((1, out_pad), jnp.float32)], axis=0)

    # Tile the nonzeros; pad to a multiple of the tile (zero values, index -1) so the
    # padding never touches the sums, the counts, or the global mean.
    tile = min(tile_nnz, _rup(nnz, 128))
    nnz_pad = _rup(nnz, tile)
    num_tiles = nnz_pad // tile

    # Feature-major values with a ones row (counts): (D+1, NNZ_pad), NNZ on lanes.
    vals_t = jnp.concatenate(
        [values.astype(jnp.float32).T, jnp.ones((1, nnz), jnp.float32)], axis=0)
    vals_t = jnp.pad(vals_t, ((0, 0), (0, nnz_pad - nnz)))
    ridx = jnp.pad(row_idx.reshape(-1).astype(jnp.int32), (0, nnz_pad - nnz),
                   constant_values=-1).reshape(1, nnz_pad)
    cidx = jnp.pad(col_idx.reshape(-1).astype(jnp.int32), (0, nnz_pad - nnz),
                   constant_values=-1).reshape(1, nnz_pad)

    # Explicit VMEM budgets (double-buffered tile blocks + resident tables + scratch).
    s_pad = _rup(n_rows + n_cols + 1, 128)
    tbl = (_rup(n_rows, 8) + _rup(n_cols, 8) + 8) * out_pad
    tile_bufs = _rup(d + 1, 8) * tile + 2 * 8 * tile
    p1_est = (2 * tile_bufs + 2 * (_rup(4 * d, 8) + 8) * out_pad + 2 * tbl
              + _rup(d + 1, 8) * s_pad) * 4
    p2_est = (2 * tile_bufs + 2 * _rup(d + 1, 8) * out_pad + 2 * tbl
              + 2 * tile * out_pad) * 4

    # ---- phase 1: tiled segment-sum accumulation + weight-premultiplied tables ----
    row_w, col_w, b_eff = pl.pallas_call(
        _phase1_kernel,
        out_shape=(jax.ShapeDtypeStruct((n_rows, out_pad), jnp.float32),
                   jax.ShapeDtypeStruct((n_cols, out_pad), jnp.float32),
                   jax.ShapeDtypeStruct((1, out_pad), jnp.float32)),
        grid=(num_tiles,),
        in_specs=[
            pl.BlockSpec((d + 1, tile), lambda i: (0, i)),
            pl.BlockSpec((1, tile), lambda i: (0, i)),
            pl.BlockSpec((1, tile), lambda i: (0, i)),
            pl.BlockSpec((4 * d, out_pad), lambda i: (0, 0)),
            pl.BlockSpec((1, out_pad), lambda i: (0, 0)),
        ],
        out_specs=(pl.BlockSpec((n_rows, out_pad), lambda i: (0, 0)),
                   pl.BlockSpec((n_cols, out_pad), lambda i: (0, 0)),
                   pl.BlockSpec((1, out_pad), lambda i: (0, 0))),
        scratch_shapes=[pltpu.VMEM((d + 1, n_rows + n_cols + 1), jnp.float32)],
        compiler_params=pltpu.CompilerParams(
            dimension_semantics=("arbitrary",),
            vmem_limit_bytes=_vmem_limit(p1_est)),
    )(vals_t, ridx, cidx, w_p, b_p)

    # ---- phase 2: per-tile gather + single fused matmul + bias + leaky_relu ----
    out_padded = pl.pallas_call(
        _phase2_kernel,
        out_shape=jax.ShapeDtypeStruct((nnz_pad, out_pad), jnp.float32),
        grid=(num_tiles,),
        in_specs=[
            pl.BlockSpec((d + 1, tile), lambda i: (0, i)),
            pl.BlockSpec((1, tile), lambda i: (0, i)),
            pl.BlockSpec((1, tile), lambda i: (0, i)),
            pl.BlockSpec((d + 1, out_pad), lambda i: (0, 0)),
            pl.BlockSpec((n_rows, out_pad), lambda i: (0, 0)),
            pl.BlockSpec((n_cols, out_pad), lambda i: (0, 0)),
            pl.BlockSpec((1, out_pad), lambda i: (0, 0)),
        ],
        out_specs=pl.BlockSpec((tile, out_pad), lambda i: (i, 0)),
        compiler_params=pltpu.CompilerParams(
            dimension_semantics=("parallel",),
            vmem_limit_bytes=_vmem_limit(p2_est)),
    )(vals_t, ridx, cidx, w0_ext, row_w, col_w, b_eff)

    return out_padded[:nnz, :out_dim]


def ref_forward(values, row_idx, col_idx, w_t, b, n_rows, n_cols):
    """Pure-JAX reference mirroring the PyTorch forward."""
    r = row_idx[:, 0]
    c = col_idx[:, 0]
    d = values.shape[1]
    row_sum = jnp.zeros((n_rows, d), jnp.float32).at[r].add(values)
    row_cnt = jnp.zeros((n_rows, 1), jnp.float32).at[r].add(1.0)
    col_pool = (row_sum / jnp.maximum(row_cnt, 1.0))[r]          # Pool(axis=1)
    col_sum = jnp.zeros((n_cols, d), jnp.float32).at[c].add(values)
    col_cnt = jnp.zeros((n_cols, 1), jnp.float32).at[c].add(1.0)
    row_pool = (col_sum / jnp.maximum(col_cnt, 1.0))[c]          # Pool(axis=0)
    glob = jnp.broadcast_to(values.mean(axis=0, keepdims=True), values.shape)
    x = jnp.concatenate([values, row_pool, col_pool, glob], axis=1)
    out = x @ w_t + b
    return jnp.where(out > 0, out, 0.01 * out)


if __name__ == "__main__":
    key = jax.random.PRNGKey(0)
    k_idx, k_val, k_w, k_b = jax.random.split(key, 4)

    IN_DIM, OUT_DIM = 8, 16
    N_ROWS, N_COLS = 8, 8
    NNZ = 32

    # Unique (row, col) index pairs so the COO tensor is already coalesced.
    perm = jax.random.permutation(k_idx, N_ROWS * N_COLS)[:NNZ]
    row_idx = (perm // N_COLS).astype(jnp.int32)[:, None]        # (NNZ, 1)
    col_idx = (perm % N_COLS).astype(jnp.int32)[:, None]         # (NNZ, 1)

    values = jax.random.normal(k_val, (NNZ, IN_DIM), jnp.float32)

    # Deterministic parameters: Linear(in_dim*4, out_dim); we keep weight.T directly.
    w_t = 0.1 * jax.random.normal(k_w, (4 * IN_DIM, OUT_DIM), jnp.float32)
    b = 0.1 * jax.random.normal(k_b, (1, OUT_DIM), jnp.float32)

    out = exchangeable_forward(values, row_idx, col_idx, w_t, b,
                               n_rows=N_ROWS, n_cols=N_COLS)
    out = jax.block_until_ready(out)

    ref = ref_forward(values, row_idx, col_idx, w_t, b, N_ROWS, N_COLS)
    assert out.shape == (NNZ, OUT_DIM)
    assert jnp.allclose(out, ref, rtol=1e-3, atol=1e-3), "mismatch vs. pure-JAX reference"

    # TODO(synk): coalescing duplicate indices and re-wrapping the (NNZ, OUT) values into
    # a sparse COO container has no Pallas equivalent; the kernel returns the new nonzero
    # values for the (unchanged, assumed-coalesced) indices.
    print("KERNEL_OK")
</pallas_src>

<mosaic_0001>
module attributes {stable_mosaic.version = 11 : i64} {
  func.func @_phase1_kernel(%arg0: i32, %arg1: memref<9x128xf32, #tpu.memory_space<vmem>>, %arg2: memref<1x128xi32, #tpu.memory_space<vmem>>, %arg3: memref<1x128xi32, #tpu.memory_space<vmem>>, %arg4: memref<32x128xf32, #tpu.memory_space<vmem>>, %arg5: memref<1x128xf32, #tpu.memory_space<vmem>>, %arg6: memref<8x128xf32, #tpu.memory_space<vmem>>, %arg7: memref<8x128xf32, #tpu.memory_space<vmem>>, %arg8: memref<1x128xf32, #tpu.memory_space<vmem>>, %arg9: memref<9x17xf32, #tpu.memory_space<vmem>>) attributes {dimension_semantics = [#tpu.dimension_semantics<arbitrary>], iteration_bounds = array<i64: 1>, scalar_prefetch = 0 : i64, scratch_operands = 1 : i64, tpu.core_type = #tpu.core_type<tc>, window_params = [{transform_indices = @transform_0, window_bounds = array<i64: 9, 128>}, {transform_indices = @transform_1, window_bounds = array<i64: 1, 128>}, {transform_indices = @transform_2, window_bounds = array<i64: 1, 128>}, {pipeline_mode = #tpu.pipeline_mode<synchronous>, transform_indices = @transform_3, window_bounds = array<i64: 32, 128>}, {pipeline_mode = #tpu.pipeline_mode<synchronous>, transform_indices = @transform_4, window_bounds = array<i64: 1, 128>}, {pipeline_mode = #tpu.pipeline_mode<synchronous>, transform_indices = @transform_5, window_bounds = array<i64: 8, 128>}, {pipeline_mode = #tpu.pipeline_mode<synchronous>, transform_indices = @transform_6, window_bounds = array<i64: 8, 128>}, {pipeline_mode = #tpu.pipeline_mode<synchronous>, transform_indices = @transform_7, window_bounds = array<i64: 1, 128>}]} {
    %c0_i32 = arith.constant 0 : i32
    %0 = arith.cmpi eq, %arg0, %c0_i32 : i32
    %1 = arith.extui %0 : i1 to i32
    %c0_i32_0 = arith.constant 0 : i32
    %2 = arith.cmpi ne, %1, %c0_i32_0 : i32
    scf.if %2 {
      %cst_12 = arith.constant 0.000000e+00 : f32
      %26 = vector.broadcast %cst_12 : f32 to vector<9x17xf32>
      %c0_13 = arith.constant 0 : index
      %c0_14 = arith.constant 0 : index
      %27 = vector.load %arg9[%c0_13, %c0_14] : memref<9x17xf32, #tpu.memory_space<vmem>>, vector<9x17xf32>
      tpu.vector_store %arg9[%c0_13, %c0_14], %26 {strides = array<i32>} : memref<9x17xf32, #tpu.memory_space<vmem>>, vector<9x17xf32>,
    } else {
    }
    %c0 = arith.constant 0 : index
    %c0_1 = arith.constant 0 : index
    %3 = vector.load %arg1[%c0, %c0_1] : memref<9x128xf32, #tpu.memory_space<vmem>>, vector<9x128xf32>
    %c0_2 = arith.constant 0 : index
    %c0_3 = arith.constant 0 : index
    %4 = vector.load %arg2[%c0_2, %c0_3] : memref<1x128xi32, #tpu.memory_space<vmem>>, vector<1x128xi32>
    %c0_4 = arith.constant 0 : index
    %c0_5 = arith.constant 0 : index
    %5 = vector.load %arg3[%c0_4, %c0_5] : memref<1x128xi32, #tpu.memory_space<vmem>>, vector<1x128xi32>
    %6 = tpu.iota {dimensions = array<i32: 0>} : vector<17x128xi32>
    %7 = vector.broadcast %4 : vector<1x128xi32> to vector<17x128xi32>
    %8 = arith.cmpi eq, %6, %7 : vector<17x128xi32>
    %c8_i32 = arith.constant 8 : i32
    %9 = vector.broadcast %c8_i32 : i32 to vector<1x128xi32>
    %10 = arith.addi %5, %9 : vector<1x128xi32>
    %11 = vector.broadcast %10 : vector<1x128xi32> to vector<17x128xi32>
    %12 = arith.cmpi eq, %6, %11 : vector<17x128xi32>
    %13 = arith.ori %8, %12 : vector<17x128xi1>
    %c16_i32 = arith.constant 16 : i32
    %14 = vector.broadcast %c16_i32 : i32 to vector<17x128xi32>
    %15 = arith.cmpi eq, %6, %14 : vector<17x128xi32>
    %16 = arith.ori %13, %15 : vector<17x128xi1>
    %17 = arith.extui %16 : vector<17x128xi1> to vector<17x128xi32>
    %18 = arith.sitofp %17 : vector<17x128xi32> to vector<17x128xf32>
    %c0_6 = arith.constant 0 : index
    %c0_7 = arith.constant 0 : index
    %19 = vector.load %arg9[%c0_6, %c0_7] : memref<9x17xf32, #tpu.memory_space<vmem>>, vector<9x17xf32>
    %cst = arith.constant dense<0.000000e+00> : vector<9x17xf32>
    %20 = tpu.matmul %3, %18, %cst {dimension_numbers = #tpu.dot_dimension_numbers<[1], [1], [0], [0], [0, 0, 1, 0], [], []>} : vector<9x128xf32>, vector<17x128xf32>, vector<9x17xf32> -> vector<9x17xf32>
    %21 = arith.addf %19, %20 : vector<9x17xf32>
    %c0_8 = arith.constant 0 : index
    %c0_9 = arith.constant 0 : index
    %22 = vector.load %arg9[%c0_8, %c0_9] : memref<9x17xf32, #tpu.memory_space<vmem>>, vector<9x17xf32>
    tpu.vector_store %arg9[%c0_8, %c0_9], %21 {strides = array<i32>} : memref<9x17xf32, #tpu.memory_space<vmem>>, vector<9x17xf32>,
    %c0_i32_10 = arith.constant 0 : i32
    %23 = arith.cmpi eq, %arg0, %c0_i32_10 : i32
    %24 = arith.extui %23 : i1 to i32
    %c0_i32_11 = arith.constant 0 : i32
    %25 = arith.cmpi ne, %24, %c0_i32_11 : i32
    scf.if %25 {
      %c0_12 = arith.constant 0 : index
      %c0_13 = arith.constant 0 : index
      %26 = vector.load %arg9[%c0_12, %c0_13] : memref<9x17xf32, #tpu.memory_space<vmem>>, vector<9x17xf32>
      %27 = vector.extract_strided_slice %26 {offsets = [0, 0], sizes = [8, 17], strides = [1, 1]} : vector<9x17xf32> to vector<8x17xf32>
      %28 = vector.extract_strided_slice %26 {offsets = [8, 0], sizes = [1, 17], strides = [1, 1]} : vector<9x17xf32> to vector<1x17xf32>
      %cst_14 = arith.constant 1.000000e+00 : f32
      %29 = vector.broadcast %cst_14 : f32 to vector<1x17xf32>
      %30 = arith.maximumf %28, %29 : vector<1x17xf32>
      %31 = vector.broadcast %30 : vector<1x17xf32> to vector<8x17xf32>
      %32 = arith.divf %27, %31 : vector<8x17xf32>
      %33 = vector.extract_strided_slice %32 {offsets = [0, 0], sizes = [8, 8], strides = [1, 1]} : vector<8x17xf32> to vector<8x8xf32>
      %34 = vector.extract_strided_slice %32 {offsets = [0, 8], sizes = [8, 8], strides = [1, 1]} : vector<8x17xf32> to vector<8x8xf32>
      %35 = vector.extract_strided_slice %32 {offsets = [0, 16], sizes = [8, 1], strides = [1, 1]} : vector<8x17xf32> to vector<8x1xf32>
      %c0_15 = arith.constant 0 : index
      %c0_16 = arith.constant 0 : index
      %36 = vector.load %arg4[%c0_15, %c0_16] : memref<32x128xf32, #tpu.memory_space<vmem>>, vector<32x128xf32>
      %37 = vector.extract_strided_slice %36 {offsets = [8, 0], sizes = [8, 128], strides = [1, 1]} : vector<32x128xf32> to vector<8x128xf32>
      %cst_17 = arith.constant dense<0.000000e+00> : vector<8x128xf32>
      %38 = tpu.matmul %34, %37, %cst_17 {dimension_numbers = #tpu.dot_dimension_numbers<[0], [0], [1], [1], [0, 1, 1, 1], [], []>} : vector<8x8xf32>, vector<8x128xf32>, vector<8x128xf32> -> vector<8x128xf32>
      %c0_18 = arith.constant 0 : index
      %c0_19 = arith.constant 0 : index
      %39 = vector.load %arg7[%c0_18, %c0_19] : memref<8x128xf32, #tpu.memory_space<vmem>>, vector<8x128xf32>
      tpu.vector_store %arg7[%c0_18, %c0_19], %38 {strides = array<i32>} : memref<8x128xf32, #tpu.memory_space<vmem>>, vector<8x128xf32>,
      %40 = vector.extract_strided_slice %36 {offsets = [16, 0], sizes = [8, 128], strides = [1, 1]} : vector<32x128xf32> to vector<8x128xf32>
      %cst_20 = arith.constant dense<0.000000e+00> : vector<8x128xf32>
      %41 = tpu.matmul %33, %40, %cst_20 {dimension_numbers = #tpu.dot_dimension_numbers<[0], [0], [1], [1], [0, 1, 1, 1], [], []>} : vector<8x8xf32>, vector<8x128xf32>, vector<8x128xf32> -> vector<8x128xf32>
      %c0_21 = arith.constant 0 : index
      %c0_22 = arith.constant 0 : index
      %42 = vector.load %arg6[%c0_21, %c0_22] : memref<8x128xf32, #tpu.memory_space<vmem>>, vector<8x128xf32>
      tpu.vector_store %arg6[%c0_21, %c0_22], %41 {strides = array<i32>} : memref<8x128xf32, #tpu.memory_space<vmem>>, vector<8x128xf32>,
      %c0_23 = arith.constant 0 : index
      %c0_24 = arith.constant 0 : index
      %43 = vector.load %arg5[%c0_23, %c0_24] : memref<1x128xf32, #tpu.memory_space<vmem>>, vector<1x128xf32>
      %44 = vector.extract_strided_slice %36 {offsets = [24, 0], sizes = [8, 128], strides = [1, 1]} : vector<32x128xf32> to vector<8x128xf32>
      %cst_25 = arith.constant dense<0.000000e+00> : vector<1x128xf32>
      %45 = tpu.matmul %35, %44, %cst_25 {dimension_numbers = #tpu.dot_dimension_numbers<[0], [0], [1], [1], [0, 1, 1, 1], [], []>} : vector<8x1xf32>, vector<8x128xf32>, vector<1x128xf32> -> vector<1x128xf32>
      %46 = arith.addf %43, %45 : vector<1x128xf32>
      %c0_26 = arith.constant 0 : index
      %c0_27 = arith.constant 0 : index
      %47 = vector.load %arg8[%c0_26, %c0_27] : memref<1x128xf32, #tpu.memory_space<vmem>>, vector<1x128xf32>
      tpu.vector_store %arg8[%c0_26, %c0_27], %46 {strides = array<i32>} : memref<1x128xf32, #tpu.memory_space<vmem>>, vector<1x128xf32>,
    } else {
    }
    return
  }
  func.func @transform_0(%arg0: i32) -> (i32, i32) {
    %c0_i32 = arith.constant 0 : i32
    %c0_i32_0 = arith.constant 0 : i32
    return %c0_i32, %arg0 : i32, i32
  }
  func.func @transform_1(%arg0: i32) -> (i32, i32) {
    %c0_i32 = arith.constant 0 : i32
    %c0_i32_0 = arith.constant 0 : i32
    return %c0_i32, %arg0 : i32, i32
  }
  func.func @transform_2(%arg0: i32) -> (i32, i32) {
    %c0_i32 = arith.constant 0 : i32
    %c0_i32_0 = arith.constant 0 : i32
    return %c0_i32, %arg0 : i32, i32
  }
  func.func @transform_3(%arg0: i32) -> (i32, i32) {
    %c0_i32 = arith.constant 0 : i32
    %c0_i32_0 = arith.constant 0 : i32
    %c0_i32_1 = arith.constant 0 : i32
    return %c0_i32, %c0_i32_0 : i32, i32
  }
  func.func @transform_4(%arg0: i32) -> (i32, i32) {
    %c0_i32 = arith.constant 0 : i32
    %c0_i32_0 = arith.constant 0 : i32
    %c0_i32_1 = arith.constant 0 : i32
    return %c0_i32, %c0_i32_0 : i32, i32
  }
  func.func @transform_5(%arg0: i32) -> (i32, i32) {
    %c0_i32 = arith.constant 0 : i32
    %c0_i32_0 = arith.constant 0 : i32
    %c0_i32_1 = arith.constant 0 : i32
    return %c0_i32, %c0_i32_0 : i32, i32
  }
  func.func @transform_6(%arg0: i32) -> (i32, i32) {
    %c0_i32 = arith.constant 0 : i32
    %c0_i32_0 = arith.constant 0 : i32
    %c0_i32_1 = arith.constant 0 : i32
    return %c0_i32, %c0_i32_0 : i32, i32
  }
  func.func @transform_7(%arg0: i32) -> (i32, i32) {
    %c0_i32 = arith.constant 0 : i32
    %c0_i32_0 = arith.constant 0 : i32
    %c0_i32_1 = arith.constant 0 : i32
    return %c0_i32, %c0_i32_0 : i32, i32
  }
}

module attributes {stable_mosaic.version = 11 : i64} {
  func.func @_phase2_kernel(%arg0: i32, %arg1: memref<9x128xf32, #tpu.memory_space<vmem>>, %arg2: memref<1x128xi32, #tpu.memory_space<vmem>>, %arg3: memref<1x128xi32, #tpu.memory_space<vmem>>, %arg4: memref<9x128xf32, #tpu.memory_space<vmem>>, %arg5: memref<8x128xf32, #tpu.memory_space<vmem>>, %arg6: memref<8x128xf32, #tpu.memory_space<vmem>>, %arg7: memref<1x128xf32, #tpu.memory_space<vmem>>, %arg8: memref<128x128xf32, #tpu.memory_space<vmem>>) attributes {dimension_semantics = [#tpu.dimension_semantics<parallel>], iteration_bounds = array<i64: 1>, scalar_prefetch = 0 : i64, scratch_operands = 0 : i64, tpu.core_type = #tpu.core_type<tc>, window_params = [{transform_indices = @transform_0, window_bounds = array<i64: 9, 128>}, {transform_indices = @transform_1, window_bounds = array<i64: 1, 128>}, {transform_indices = @transform_2, window_bounds = array<i64: 1, 128>}, {pipeline_mode = #tpu.pipeline_mode<synchronous>, transform_indices = @transform_3, window_bounds = array<i64: 9, 128>}, {pipeline_mode = #tpu.pipeline_mode<synchronous>, transform_indices = @transform_4, window_bounds = array<i64: 8, 128>}, {pipeline_mode = #tpu.pipeline_mode<synchronous>, transform_indices = @transform_5, window_bounds = array<i64: 8, 128>}, {pipeline_mode = #tpu.pipeline_mode<synchronous>, transform_indices = @transform_6, window_bounds = array<i64: 1, 128>}, {transform_indices = @transform_7, window_bounds = array<i64: 128, 128>}]} {
    %c0 = arith.constant 0 : index
    %c0_0 = arith.constant 0 : index
    %0 = vector.load %arg1[%c0, %c0_0] : memref<9x128xf32, #tpu.memory_space<vmem>>, vector<9x128xf32>
    %c0_1 = arith.constant 0 : index
    %c0_2 = arith.constant 0 : index
    %1 = vector.load %arg4[%c0_1, %c0_2] : memref<9x128xf32, #tpu.memory_space<vmem>>, vector<9x128xf32>
    %cst = arith.constant dense<0.000000e+00> : vector<128x128xf32>
    %2 = tpu.matmul %0, %1, %cst {dimension_numbers = #tpu.dot_dimension_numbers<[0], [0], [1], [1], [0, 1, 1, 1], [], []>} : vector<9x128xf32>, vector<9x128xf32>, vector<128x128xf32> -> vector<128x128xf32>
    %c0_3 = arith.constant 0 : index
    %c0_4 = arith.constant 0 : index
    %3 = vector.load %arg2[%c0_3, %c0_4] : memref<1x128xi32, #tpu.memory_space<vmem>>, vector<1x128xi32>
    %c0_5 = arith.constant 0 : index
    %c0_6 = arith.constant 0 : index
    %4 = vector.load %arg3[%c0_5, %c0_6] : memref<1x128xi32, #tpu.memory_space<vmem>>, vector<1x128xi32>
    %5 = tpu.iota {dimensions = array<i32: 0>} : vector<8x128xi32>
    %6 = vector.broadcast %3 : vector<1x128xi32> to vector<8x128xi32>
    %7 = arith.cmpi eq, %5, %6 : vector<8x128xi32>
    %8 = arith.extui %7 : vector<8x128xi1> to vector<8x128xi32>
    %9 = arith.sitofp %8 : vector<8x128xi32> to vector<8x128xf32>
    %10 = tpu.iota {dimensions = array<i32: 0>} : vector<8x128xi32>
    %11 = vector.broadcast %4 : vector<1x128xi32> to vector<8x128xi32>
    %12 = arith.cmpi eq, %10, %11 : vector<8x128xi32>
    %13 = arith.extui %12 : vector<8x128xi1> to vector<8x128xi32>
    %14 = arith.sitofp %13 : vector<8x128xi32> to vector<8x128xf32>
    %c0_7 = arith.constant 0 : index
    %c0_8 = arith.constant 0 : index
    %15 = vector.load %arg5[%c0_7, %c0_8] : memref<8x128xf32, #tpu.memory_space<vmem>>, vector<8x128xf32>
    %cst_9 = arith.constant dense<0.000000e+00> : vector<128x128xf32>
    %16 = tpu.matmul %9, %15, %cst_9 {dimension_numbers = #tpu.dot_dimension_numbers<[0], [0], [1], [1], [0, 1, 1, 1], [], []>} : vector<8x128xf32>, vector<8x128xf32>, vector<128x128xf32> -> vector<128x128xf32>
    %17 = arith.addf %2, %16 : vector<128x128xf32>
    %c0_10 = arith.constant 0 : index
    %c0_11 = arith.constant 0 : index
    %18 = vector.load %arg6[%c0_10, %c0_11] : memref<8x128xf32, #tpu.memory_space<vmem>>, vector<8x128xf32>
    %cst_12 = arith.constant dense<0.000000e+00> : vector<128x128xf32>
    %19 = tpu.matmul %14, %18, %cst_12 {dimension_numbers = #tpu.dot_dimension_numbers<[0], [0], [1], [1], [0, 1, 1, 1], [], []>} : vector<8x128xf32>, vector<8x128xf32>, vector<128x128xf32> -> vector<128x128xf32>
    %20 = arith.addf %17, %19 : vector<128x128xf32>
    %c0_13 = arith.constant 0 : index
    %c0_14 = arith.constant 0 : index
    %21 = vector.load %arg7[%c0_13, %c0_14] : memref<1x128xf32, #tpu.memory_space<vmem>>, vector<1x128xf32>
    %22 = vector.broadcast %21 : vector<1x128xf32> to vector<128x128xf32>
    %23 = arith.addf %20, %22 : vector<128x128xf32>
    %cst_15 = arith.constant 0.000000e+00 : f32
    %24 = vector.broadcast %cst_15 : f32 to vector<128x128xf32>
    %25 = arith.cmpf ogt, %23, %24 : vector<128x128xf32>
    %cst_16 = arith.constant 0.00999999977 : f32
    %26 = vector.broadcast %cst_16 : f32 to vector<128x128xf32>
    %27 = arith.mulf %26, %23 : vector<128x128xf32>
    %28 = arith.select %25, %23, %27 : vector<128x128xi1>, vector<128x128xf32>
    %c0_17 = arith.constant 0 : index
    %c0_18 = arith.constant 0 : index
    %29 = vector.load %arg8[%c0_17, %c0_18] : memref<128x128xf32, #tpu.memory_space<vmem>>, vector<128x128xf32>
    tpu.vector_store %arg8[%c0_17, %c0_18], %28 {strides = array<i32>} : memref<128x128xf32, #tpu.memory_space<vmem>>, vector<128x128xf32>,
    return
  }
  func.func @transform_0(%arg0: i32) -> (i32, i32) {
    %c0_i32 = arith.constant 0 : i32
    %c0_i32_0 = arith.constant 0 : i32
    return %c0_i32, %arg0 : i32, i32
  }
  func.func @transform_1(%arg0: i32) -> (i32, i32) {
    %c0_i32 = arith.constant 0 : i32
    %c0_i32_0 = arith.constant 0 : i32
    return %c0_i32, %arg0 : i32, i32
  }
  func.func @transform_2(%arg0: i32) -> (i32, i32) {
    %c0_i32 = arith.constant 0 : i32
    %c0_i32_0 = arith.constant 0 : i32
    return %c0_i32, %arg0 : i32, i32
  }
  func.func @transform_3(%arg0: i32) -> (i32, i32) {
    %c0_i32 = arith.constant 0 : i32
    %c0_i32_0 = arith.constant 0 : i32
    %c0_i32_1 = arith.constant 0 : i32
    return %c0_i32, %c0_i32_0 : i32, i32
  }
  func.func @transform_4(%arg0: i32) -> (i32, i32) {
    %c0_i32 = arith.constant 0 : i32
    %c0_i32_0 = arith.constant 0 : i32
    %c0_i32_1 = arith.constant 0 : i32
    return %c0_i32, %c0_i32_0 : i32, i32
  }
  func.func @transform_5(%arg0: i32) -> (i32, i32) {
    %c0_i32 = arith.constant 0 : i32
    %c0_i32_0 = arith.constant 0 : i32
    %c0_i32_1 = arith.constant 0 : i32
    return %c0_i32, %c0_i32_0 : i32, i32
  }
  func.func @transform_6(%arg0: i32) -> (i32, i32) {
    %c0_i32 = arith.constant 0 : i32
    %c0_i32_0 = arith.constant 0 : i32
    %c0_i32_1 = arith.constant 0 : i32
    return %c0_i32, %c0_i32_0 : i32, i32
  }
  func.func @transform_7(%arg0: i32) -> (i32, i32) {
    %c0_i32 = arith.constant 0 : i32
    %c0_i32_0 = arith.constant 0 : i32
    return %arg0, %c0_i32 : i32, i32
  }
}

</mosaic_0001>

<bundles_post_ra>
// kernel: exchangeable_forward.3
= control target key start
LH: loop header
LB: loop body
LE: loop exit
PB: predicated region body
PF: predicated region fallthrough
CT: control target
= control target key end

     0   :  { %v32_v0 = vlaneseq  ;;  %v1027_v5 = vmov 0.0   ;;  %vm356_vm2 = vcmask 1040384   ;;  %vm81_vm3 = vcmask 64512   ;;  %s1238_s1 = inlined_call_operand.vmem [shape: s32[1,128], index: 1, kind: input, shape index: {}]   ;;  %s1239_s2 = inlined_call_operand.vmem [shape: s32[1,128], index: 2, kind: input, shape index: {}]   ;;  %s1240_s4 = inlined_call_operand.vmem [shape: f32[8,128], index: 4, kind: input, shape index: {}]   ;;  %s1241_s0 = inlined_call_operand.vmem [shape: f32[9,128], index: 0, kind: input, shape index: {}]   ;;  %s1242_s3 = inlined_call_operand.vmem [shape: f32[9,128], index: 3, kind: input, shape index: {}]   ;;  %s1243_s5 = inlined_call_operand.vmem [shape: f32[8,128], index: 5, kind: input, shape index: {}]   ;;  %s1244_s6 = inlined_call_operand.vmem [shape: f32[1,128], index: 6, kind: input, shape index: {}]   ;;  %s1245_s7 = inlined_call_operand.vmem [shape: f32[128,128], index: 7, kind: output, shape index: {}]  }
   0x1   :  { %v838_v1 = vld [vmem:[%s1238_s1] ss:$0 sm:$0xff]  ;;  %v29_v9 = vld [vmem:[%s1242_s3 + $0x8] sm:$0x1]  ;;  %vm307_vm4 = vcmask 72704  }
   0x2   :  { %v840_v2 = vld [vmem:[%s1239_s2] ss:$0 sm:$0xff]  ;;  %v33_v3 = vshrl.u32 %v32_v0, 7  ;;  %v27_v10 = vld [vmem:[%s1241_s0 + $0x8] sm:$0x1] }
   0x3   :  { %v48_v4 = vld [vmem:[%s1240_s4] sm:$0xff] }
   0x4   :  { %vm38_vm0 = vcmp.eq.s32.totalorder %v33_v3, %v838_v1  ;;  %vm45_vm1 = vcmp.eq.s32.totalorder %v33_v3, %v840_v2  ;;  %944 = vmatprep.subr.mxu0 %v48_v4  ;;  %1024 = vmatprep.subr.mxu1 %v48_v4  ;;  %v26_v8 = vld [vmem:[%s1241_s0] sm:$0xff] }
   0x5   :  { %v839_v6 = vsel %vm38_vm0, 1.0, %v1027_v5  ;;  %v841_v7 = vsel %vm45_vm1, 1.0, %v1027_v5  ;;  %945 = vmatpush3.msra.mxu0 %v48_v4  ;;  %1025 = vmatpush3.msra.mxu1 %v48_v4  ;;  %v505_v11 = vld [vmem:[%s1243_s5] sm:$0xff] }
   0x6   :  { %49 = vxpose.xlu0.b32.start.end [1/1] (short) %v839_v6, 128  ;;  %506 = vxpose.xlu1.b32.start.end [1/1] (short) %v841_v7, 128  ;;  %v28_v31 = vld [vmem:[%s1242_s3] sm:$0xff] }
   0x7   :  { %970 = vmatprep.subr.msk.mxu1 %vm356_vm2, %v29_v9  ;;  %998 = vmatprep.subr.mxu0 %v505_v11 }
  0x43   :  { %275 = vxpose.xlu0.b32.start [1/2] (short) %v26_v8, 128 }
  0x47   :  { %276 = vxpose.xlu0.b32.end [2/2] (short) %v27_v10, 128 }
  0x82   :  { %v65_v12 = vpop.trf.xlu0  ;;  %v522_v13 = vpop.trf.xlu1 }
  0x83   :  { %946 = vmatprep.mubr.msk.f32.mxu0 %vm81_vm3, %v65_v12 }
  0x86   :  { %v66_v14 = vpop.trf.xlu0  ;;  %v523_v15 = vpop.trf.xlu1 }
  0x87   :  { %947 = vmatmul.mubr.msk.f32.vlgmr.msra.gmra.mxu0 %vm81_vm3, %v66_v14 }
  0x88   :  { %999 = vmatpush3.msra.mxu0 %v505_v11 }
  0x8a   :  { %v67_v16 = vpop.trf.xlu0  ;;  %v524_v17 = vpop.trf.xlu1 }
  0x8b   :  { %949 = vmatprep.mubr.msk.f32.mxu0 %vm81_vm3, %v67_v16  ;;  %v1163_v16 = vld [vmem:[%s1244_s6] ss:$0 sm:$0xff] }
  0x8e   :  { %v68_v18 = vpop.trf.xlu0  ;;  %v525_v19 = vpop.trf.xlu1 }
  0x8f   :  { %950 = vmatmul.mubr.msk.f32.gmra.mxu0 %vm81_vm3, %v68_v18 }
  0x92   :  { %v69_v20 = vpop.trf.xlu0  ;;  %v526_v21 = vpop.trf.xlu1 }
  0x93   :  { %952 = vmatprep.mubr.msk.f32.mxu0 %vm81_vm3, %v69_v20 }
  0x96   :  { %v70_v22 = vpop.trf.xlu0  ;;  %v527_v23 = vpop.trf.xlu1 }
  0x97   :  { %953 = vmatmul.mubr.msk.f32.gmra.mxu0 %vm81_vm3, %v70_v22 }
  0x9a   :  { %v71_v24 = vpop.trf.xlu0  ;;  %v528_v25 = vpop.trf.xlu1 }
  0x9b   :  { %955 = vmatprep.mubr.msk.f32.mxu0 %vm81_vm3, %v71_v24 }
  0x9e   :  { %v72_v26 = vpop.trf.xlu0  ;;  %v529_v27 = vpop.trf.xlu1 }
  0x9f   :  { %956 = vmatmul.mubr.msk.f32.gmra.mxu0 %vm81_vm3, %v72_v26 }
  0xa0   :  { %1000 = vmatprep.mubr.msk.f32.mxu0 %vm81_vm3, %v522_v13 }
  0xa2   :  { %v73_v28 = vpop.trf.xlu0  ;;  %v530_v29 = vpop.trf.xlu1 }
  0xa3   :  { %958 = vmatprep.mubr.msk.f32.mxu1 %vm81_vm3, %v73_v28  ;;  %1001 = vmatmul.mubr.msk.f32.vlgmr.msra.gmra.mxu0 %vm81_vm3, %v523_v15 }
  0xa4   :  { %1003 = vmatprep.mubr.msk.f32.mxu0 %vm81_vm3, %v524_v17 }
  0xa6   :  { %v74_v30 = vpop.trf.xlu0  ;;  %v531_v32 = vpop.trf.xlu1 }
  0xa7   :  { %959 = vmatmul.mubr.msk.f32.vlgmr.msra.gmra.mxu1 %vm81_vm3, %v74_v30  ;;  %1004 = vmatmul.mubr.msk.f32.gmra.mxu0 %vm81_vm3, %v525_v19 }
  0xa8   :  { %971 = vmatpush3.msk.msra.mxu1 %vm356_vm2, %v29_v9  ;;  %1006 = vmatprep.mubr.msk.f32.mxu0 %vm81_vm3, %v526_v21 }
  0xa9   :  { %972 = vmatprep.subr.mxu1 %v28_v31 }
  0xaa   :  { %v75_v33 = vpop.trf.xlu0  ;;  %973 = vmatpush3.msra.mxu1 %v28_v31  ;;  %v532_v34 = vpop.trf.xlu1 }
  0xab   :  { %961 = vmatprep.mubr.msk.f32.mxu1 %vm81_vm3, %v75_v33  ;;  %1007 = vmatmul.mubr.msk.f32.gmra.mxu0 %vm81_vm3, %v527_v23 }
  0xac   :  { %1009 = vmatprep.mubr.msk.f32.mxu0 %vm81_vm3, %v528_v25 }
  0xae   :  { %v76_v35 = vpop.trf.xlu0  ;;  %v533_v36 = vpop.trf.xlu1 }
  0xaf   :  { %962 = vmatmul.mubr.msk.f32.gmra.mxu1 %vm81_vm3, %v76_v35  ;;  %1010 = vmatmul.mubr.msk.f32.gmra.mxu0 %vm81_vm3, %v529_v27 }
  0xb0   :  { %1012 = vmatprep.mubr.msk.f32.mxu0 %vm81_vm3, %v530_v29 }
  0xb2   :  { %v77_v37 = vpop.trf.xlu0  ;;  %v534_v38 = vpop.trf.xlu1 }
  0xb3   :  { %964 = vmatprep.mubr.msk.f32.mxu1 %vm81_vm3, %v77_v37  ;;  %1013 = vmatmul.mubr.msk.f32.gmra.mxu0 %vm81_vm3, %v531_v32 }
  0xb4   :  { %1015 = vmatprep.mubr.msk.f32.mxu0 %vm81_vm3, %v532_v34 }
  0xb6   :  { %v78_v39 = vpop.trf.xlu0  ;;  %v535_v40 = vpop.trf.xlu1 }
  0xb7   :  { %965 = vmatmul.mubr.msk.f32.gmra.mxu1 %vm81_vm3, %v78_v39  ;;  %1016 = vmatmul.mubr.msk.f32.gmra.mxu0 %vm81_vm3, %v533_v36 }
  0xb8   :  { %1018 = vmatprep.mubr.msk.f32.mxu0 %vm81_vm3, %v534_v38 }
  0xba   :  { %v79_v41 = vpop.trf.xlu0  ;;  %v536_v42 = vpop.trf.xlu1 }
  0xbb   :  { %967 = vmatprep.mubr.msk.f32.mxu1 %vm81_vm3, %v79_v41  ;;  %1019 = vmatmul.mubr.msk.f32.gmra.mxu0 %vm81_vm3, %v535_v40 }
  0xbc   :  { %1021 = vmatprep.mubr.msk.f32.mxu0 %vm81_vm3, %v536_v42 }
  0xbe   :  { %v80_v43 = vpop.trf.xlu0  ;;  %v537_v44 = vpop.trf.xlu1 }
  0xbf   :  { %968 = vmatmul.mubr.msk.f32.gmra.mxu1 %vm81_vm3, %v80_v43  ;;  %1022 = vmatmul.mubr.msk.f32.gmra.mxu0 %vm81_vm3, %v537_v44 }
  0xc2   :  { %v291_v45 = vpop.trf.xlu0 }
  0xc3   :  { %974 = vmatprep.mubr.msk.f32.mxu1 %vm307_vm4, %v291_v45 }
  0xc6   :  { %v292_v46 = vpop.trf.xlu0 }
  0xc7   :  { %975 = vmatmul.mubr.msk.f32.vlgmr.msra.gmra.mxu1 %vm307_vm4, %v292_v46 }
  0xca   :  { %v293_v47 = vpop.trf.xlu0 }
  0xcb   :  { %977 = vmatprep.mubr.msk.f32.mxu1 %vm307_vm4, %v293_v47 }
  0xce   :  { %v294_v48 = vpop.trf.xlu0 }
  0xcf   :  { %978 = vmatmul.mubr.msk.f32.gmra.mxu1 %vm307_vm4, %v294_v48 }
  0xd2   :  { %v295_v49 = vpop.trf.xlu0 }
  0xd3   :  { %980 = vmatprep.mubr.msk.f32.mxu1 %vm307_vm4, %v295_v49 }
  0xd6   :  { %v296_v50 = vpop.trf.xlu0 }
  0xd7   :  { %981 = vmatmul.mubr.msk.f32.gmra.mxu1 %vm307_vm4, %v296_v50 }
  0xda   :  { %v297_v51 = vpop.trf.xlu0 }
  0xdb   :  { %983 = vmatprep.mubr.msk.f32.mxu1 %vm307_vm4, %v297_v51 }
  0xde   :  { %v298_v52 = vpop.trf.xlu0 }
  0xdf   :  { %984 = vmatmul.mubr.msk.f32.gmra.mxu1 %vm307_vm4, %v298_v52 }
  0xe2   :  { %v299_v53 = vpop.trf.xlu0 }
  0xe3   :  { %986 = vmatprep.mubr.msk.f32.mxu1 %vm307_vm4, %v299_v53 }
  0xe6   :  { %v300_v54 = vpop.trf.xlu0 }
  0xe7   :  { %987 = vmatmul.mubr.msk.f32.gmra.mxu1 %vm307_vm4, %v300_v54 }
  0xea   :  { %v301_v55 = vpop.trf.xlu0 }
  0xeb   :  { %989 = vmatprep.mubr.msk.f32.mxu1 %vm307_vm4, %v301_v55 }
  0xee   :  { %v302_v56 = vpop.trf.xlu0 }
  0xef   :  { %990 = vmatmul.mubr.msk.f32.gmra.mxu1 %vm307_vm4, %v302_v56 }
  0xf2   :  { %v303_v57 = vpop.trf.xlu0 }
  0xf3   :  { %992 = vmatprep.mubr.msk.f32.mxu1 %vm307_vm4, %v303_v57 }
  0xf6   :  { %v304_v58 = vpop.trf.xlu0 }
  0xf7   :  { %993 = vmatmul.mubr.msk.f32.gmra.mxu1 %vm307_vm4, %v304_v58 }
  0xfa   :  { %v305_v59 = vpop.trf.xlu0 }
  0xfb   :  { %995 = vmatprep.mubr.msk.f32.mxu1 %vm307_vm4, %v305_v59 }
  0xfe   :  { %v306_v60 = vpop.trf.xlu0 }
  0xff   :  { %996 = vmatmul.mubr.msk.f32.gmra.mxu1 %vm307_vm4, %v306_v60 }
 0x147   :  { %v948_v61 = vpop.f32.mrf.mxu0 }
 0x149   :  { %v196_v63 = vpop.f32.mrf.mxu0 }
 0x14f   :  { %v951_v1 = vpop.f32.mrf.mxu0 }
 0x151   :  { %v206_v3 = vpop.f32.mrf.mxu0 }
 0x157   :  { %v954_v5 = vpop.f32.mrf.mxu0 }
 0x159   :  { %v216_v7 = vpop.f32.mrf.mxu0 }
 0x15f   :  { %v957_v9 = vpop.f32.mrf.mxu0 }
 0x161   :  { %v1156_v11 = vpop.f32.mrf.mxu0 }
 0x163   :  { %v1002_v14 = vpop.f32.mrf.mxu0 }
 0x165   :  { %v652_v20 = vpop.f32.mrf.mxu0 }
 0x167   :  { %v1142_v62 = vpop.f32.mrf.mxu1  ;;  %v1005_v26 = vpop.f32.mrf.mxu0 }
 0x169   :  { %v1144_v0 = vpop.f32.mrf.mxu1  ;;  %v662_v34 = vpop.f32.mrf.mxu0 }
 0x16b   :  { %v1008_v40 = vpop.f32.mrf.mxu0 }
 0x16d   :  { %v672_v48 = vpop.f32.mrf.mxu0 }
 0x16f   :  { %v1146_v2 = vpop.f32.mrf.mxu1  ;;  %v1011_v54 = vpop.f32.mrf.mxu0 }
 0x171   :  { %v1148_v4 = vpop.f32.mrf.mxu1 }
 0x177   :  { %v1150_v6 = vpop.f32.mrf.mxu1 }
 0x179   :  { %v1152_v8 = vpop.f32.mrf.mxu1 }
 0x17f   :  { %v1154_v10 = vpop.f32.mrf.mxu1 }
 0x181   :  { %v1158_v12 = vpop.f32.mrf.mxu1 }
 0x187   :  { %v976_v13 = vpop.f32.mrf.mxu1 }
 0x188   :  { %v432_v15 = vadd.f32 %v976_v13, %v948_v61 }
 0x189   :  { %v426_v17 = vpop.f32.mrf.mxu1 }
 0x18a   :  { %v732_v18 = vadd.f32 %v1002_v14, %v432_v15  ;;  %v427_v19 = vadd.f32 %v426_v17, %v196_v63  ;;  %v682_v63 = vpop.f32.mrf.mxu0 }
 0x18c   :  { %v755_v21 = vadd.f32 %v1163_v16, %v732_v18  ;;  %v731_v22 = vadd.f32 %v652_v20, %v427_v19  ;;  %v1014_v13 = vpop.f32.mrf.mxu0 }
 0x18e   :  { %vm771_vm5 = vcmp.gt.f32.partialorder %v755_v21, 0.0  ;;  %v787_v23 = vmul.f32 0.01, %v755_v21  ;;  %v754_v24 = vadd.f32 %v1163_v16, %v731_v22 }
 0x18f   :  { %v979_v25 = vpop.f32.mrf.mxu1 }
 0x190   :  { %v803_v27 = vsel %vm771_vm5, %v755_v21, %v787_v23  ;;  %vm770_vm6 = vcmp.gt.f32.partialorder %v754_v24, 0.0  ;;  %v786_v28 = vmul.f32 0.01, %v754_v24  ;;  %v442_v29 = vadd.f32 %v979_v25, %v951_v1  ;;  %v692_v21 = vpop.f32.mrf.mxu0 }
 0x191   :  { %819 = vst [vmem:[%s1245_s7 + $0x8] sm:$0xff] %v803_v27  ;;  %v436_v30 = vpop.f32.mrf.mxu1 }
 0x192   :  { %v802_v31 = vsel %vm770_vm6, %v754_v24, %v786_v28  ;;  %v734_v32 = vadd.f32 %v1005_v26, %v442_v29  ;;  %v437_v33 = vadd.f32 %v436_v30, %v206_v3  ;;  %v1017_v26 = vpop.f32.mrf.mxu0 }
 0x193   :  { %818 = vst [vmem:[%s1245_s7] sm:$0xff] %v802_v31 }
 0x194   :  { %v757_v35 = vadd.f32 %v1163_v16, %v734_v32  ;;  %v733_v36 = vadd.f32 %v662_v34, %v437_v33  ;;  %v702_v33 = vpop.f32.mrf.mxu0 }
 0x196   :  { %vm773_vm7 = vcmp.gt.f32.partialorder %v757_v35, 0.0  ;;  %v789_v37 = vmul.f32 0.01, %v757_v35  ;;  %v756_v38 = vadd.f32 %v1163_v16, %v733_v36 }
 0x197   :  { %v982_v39 = vpop.f32.mrf.mxu1 }
 0x198   :  { %v805_v41 = vsel %vm773_vm7, %v757_v35, %v789_v37  ;;  %vm772_vm8 = vcmp.gt.f32.partialorder %v756_v38, 0.0  ;;  %v788_v42 = vmul.f32 0.01, %v756_v38  ;;  %v452_v43 = vadd.f32 %v982_v39, %v954_v5 }
 0x199   :  { %821 = vst [vmem:[%s1245_s7 + $0x18] sm:$0xff] %v805_v41  ;;  %v446_v44 = vpop.f32.mrf.mxu1 }
 0x19a   :  { %v804_v45 = vsel %vm772_vm8, %v756_v38, %v788_v42  ;;  %v736_v46 = vadd.f32 %v1008_v40, %v452_v43  ;;  %v447_v47 = vadd.f32 %v446_v44, %v216_v7  ;;  %v1020_v38 = vpop.f32.mrf.mxu0 }
 0x19b   :  { %820 = vst [vmem:[%s1245_s7 + $0x10] sm:$0xff] %v804_v45 }
 0x19c   :  { %v759_v49 = vadd.f32 %v1163_v16, %v736_v46  ;;  %v735_v50 = vadd.f32 %v672_v48, %v447_v47  ;;  %v712_v45 = vpop.f32.mrf.mxu0 }
 0x19e   :  { %vm775_vm9 = vcmp.gt.f32.partialorder %v759_v49, 0.0  ;;  %v791_v51 = vmul.f32 0.01, %v759_v49  ;;  %v758_v52 = vadd.f32 %v1163_v16, %v735_v50  ;;  %v1023_v50 = vpop.f32.mrf.mxu0 }
 0x19f   :  { %v985_v53 = vpop.f32.mrf.mxu1 }
 0x1a0   :  { %v807_v55 = vsel %vm775_vm9, %v759_v49, %v791_v51  ;;  %vm774_vm10 = vcmp.gt.f32.partialorder %v758_v52, 0.0  ;;  %v790_v56 = vmul.f32 0.01, %v758_v52  ;;  %v462_v57 = vadd.f32 %v985_v53, %v957_v9 }
 0x1a1   :  { %823 = vst [vmem:[%s1245_s7 + $0x28] sm:$0xff] %v807_v55  ;;  %v456_v58 = vpop.f32.mrf.mxu1 }
 0x1a2   :  { %v806_v59 = vsel %vm774_vm10, %v758_v52, %v790_v56  ;;  %v738_v60 = vadd.f32 %v1011_v54, %v462_v57  ;;  %v457_v61 = vadd.f32 %v456_v58, %v1156_v11  ;;  %v722_v57 = vpop.f32.mrf.mxu0 }
 0x1a3   :  { %822 = vst [vmem:[%s1245_s7 + $0x20] sm:$0xff] %v806_v59 }
 0x1a4   :  { %v761_v1 = vadd.f32 %v1163_v16, %v738_v60  ;;  %v737_v3 = vadd.f32 %v682_v63, %v457_v61 }
 0x1a6   :  { %vm777_vm11 = vcmp.gt.f32.partialorder %v761_v1, 0.0  ;;  %v793_v5 = vmul.f32 0.01, %v761_v1  ;;  %v760_v7 = vadd.f32 %v1163_v16, %v737_v3 }
 0x1a7   :  { %v988_v9 = vpop.f32.mrf.mxu1 }
 0x1a8   :  { %v809_v14 = vsel %vm777_vm11, %v761_v1, %v793_v5  ;;  %vm776_vm12 = vcmp.gt.f32.partialorder %v760_v7, 0.0  ;;  %v792_v15 = vmul.f32 0.01, %v760_v7  ;;  %v472_v17 = vadd.f32 %v988_v9, %v1142_v62 }
 0x1a9   :  { %825 = vst [vmem:[%s1245_s7 + $0x38] sm:$0xff] %v809_v14  ;;  %v466_v11 = vpop.f32.mrf.mxu1 }
 0x1aa   :  { %v808_v18 = vsel %vm776_vm12, %v760_v7, %v792_v15  ;;  %v740_v19 = vadd.f32 %v1014_v13, %v472_v17  ;;  %v467_v20 = vadd.f32 %v466_v11, %v1144_v0 }
 0x1ab   :  { %824 = vst [vmem:[%s1245_s7 + $0x30] sm:$0xff] %v808_v18 }
 0x1ac   :  { %v763_v22 = vadd.f32 %v1163_v16, %v740_v19  ;;  %v739_v23 = vadd.f32 %v692_v21, %v467_v20 }
 0x1ae   :  { %vm779_vm13 = vcmp.gt.f32.partialorder %v763_v22, 0.0  ;;  %v795_v24 = vmul.f32 0.01, %v763_v22  ;;  %v762_v62 = vadd.f32 %v1163_v16, %v739_v23 }
 0x1af   :  { %v991_v25 = vpop.f32.mrf.mxu1 }
 0x1b0   :  { %v811_v27 = vsel %vm779_vm13, %v763_v22, %v795_v24  ;;  %vm778_vm14 = vcmp.gt.f32.partialorder %v762_v62, 0.0  ;;  %v794_v28 = vmul.f32 0.01, %v762_v62  ;;  %v482_v29 = vadd.f32 %v991_v25, %v1146_v2 }
 0x1b1   :  { %827 = vst [vmem:[%s1245_s7 + $0x48] sm:$0xff] %v811_v27  ;;  %v476_v0 = vpop.f32.mrf.mxu1 }
 0x1b2   :  { %v810_v30 = vsel %vm778_vm14, %v762_v62, %v794_v28  ;;  %v742_v31 = vadd.f32 %v1017_v26, %v482_v29  ;;  %v477_v32 = vadd.f32 %v476_v0, %v1148_v4 }
 0x1b3   :  { %826 = vst [vmem:[%s1245_s7 + $0x40] sm:$0xff] %v810_v30 }
 0x1b4   :  { %v765_v34 = vadd.f32 %v1163_v16, %v742_v31  ;;  %v741_v35 = vadd.f32 %v702_v33, %v477_v32 }
 0x1b6   :  { %vm781_vm15 = vcmp.gt.f32.partialorder %v765_v34, 0.0  ;;  %v797_v36 = vmul.f32 0.01, %v765_v34  ;;  %v764_v2 = vadd.f32 %v1163_v16, %v741_v35 }
 0x1b7   :  { %v994_v37 = vpop.f32.mrf.mxu1 }
 0x1b8   :  { %v813_v39 = vsel %vm781_vm15, %v765_v34, %v797_v36  ;;  %vm780_vm0 = vcmp.gt.f32.partialorder %v764_v2, 0.0  ;;  %v796_v40 = vmul.f32 0.01, %v764_v2  ;;  %v492_v41 = vadd.f32 %v994_v37, %v1150_v6 }
 0x1b9   :  { %829 = vst [vmem:[%s1245_s7 + $0x58] sm:$0xff] %v813_v39  ;;  %v486_v4 = vpop.f32.mrf.mxu1 }
 0x1ba   :  { %v812_v42 = vsel %vm780_vm0, %v764_v2, %v796_v40  ;;  %v744_v43 = vadd.f32 %v1020_v38, %v492_v41  ;;  %v487_v44 = vadd.f32 %v486_v4, %v1152_v8 }
 0x1bb   :  { %828 = vst [vmem:[%s1245_s7 + $0x50] sm:$0xff] %v812_v42 }
 0x1bc   :  { %v767_v46 = vadd.f32 %v1163_v16, %v744_v43  ;;  %v743_v47 = vadd.f32 %v712_v45, %v487_v44 }
 0x1be   :  { %vm783_vm1 = vcmp.gt.f32.partialorder %v767_v46, 0.0  ;;  %v799_v48 = vmul.f32 0.01, %v767_v46  ;;  %v766_v6 = vadd.f32 %v1163_v16, %v743_v47 }
 0x1bf   :  { %v997_v49 = vpop.f32.mrf.mxu1 }
 0x1c0   :  { %v815_v51 = vsel %vm783_vm1, %v767_v46, %v799_v48  ;;  %vm782_vm2 = vcmp.gt.f32.partialorder %v766_v6, 0.0  ;;  %v798_v52 = vmul.f32 0.01, %v766_v6  ;;  %v502_v53 = vadd.f32 %v997_v49, %v1154_v10 }
 0x1c1   :  { %831 = vst [vmem:[%s1245_s7 + $0x68] sm:$0xff] %v815_v51  ;;  %v496_v8 = vpop.f32.mrf.mxu1 }
 0x1c2   :  { %v814_v54 = vsel %vm782_vm2, %v766_v6, %v798_v52  ;;  %v746_v55 = vadd.f32 %v1023_v50, %v502_v53  ;;  %v497_v56 = vadd.f32 %v496_v8, %v1158_v12 }
 0x1c3   :  { %830 = vst [vmem:[%s1245_s7 + $0x60] sm:$0xff] %v814_v54 }
 0x1c4   :  { %v769_v58 = vadd.f32 %v1163_v16, %v746_v55  ;;  %v745_v59 = vadd.f32 %v722_v57, %v497_v56 }
 0x1c6   :  { %vm785_vm3 = vcmp.gt.f32.partialorder %v769_v58, 0.0  ;;  %v801_v60 = vmul.f32 0.01, %v769_v58  ;;  %v768_v10 = vadd.f32 %v1163_v16, %v745_v59 }
 0x1c8   :  { %v817_v61 = vsel %vm785_vm3, %v769_v58, %v801_v60  ;;  %vm784_vm4 = vcmp.gt.f32.partialorder %v768_v10, 0.0  ;;  %v800_v63 = vmul.f32 0.01, %v768_v10 }
 0x1c9   :  { %833 = vst [vmem:[%s1245_s7 + $0x78] sm:$0xff] %v817_v61 }
 0x1ca   :  { %v816_v12 = vsel %vm784_vm4, %v768_v10, %v800_v63 }
 0x1cb   :  { %832 = vst [vmem:[%s1245_s7 + $0x70] sm:$0xff] %v816_v12 }

// kernel: exchangeable_forward.2
= control target key start
LH: loop header
LB: loop body
LE: loop exit
PB: predicated region body
PF: predicated region fallthrough
CT: control target
= control target key end

     0   :  { %v35_v0 = vlaneseq  ;;  %vm29_vm0 = vcmask 131072   ;;  %v559_v3 = vmov 0.0   ;;  %v560_v11 = vmov 1.0   ;;  %s563_s9 = smov 112   ;;  %s650_s1 = inlined_call_operand.vmem [shape: s32[1,128], index: 1, kind: input, shape index: {}]   ;;  %s651_s2 = inlined_call_operand.vmem [shape: s32[1,128], index: 2, kind: input, shape index: {}]   ;;  %s652_s0 = inlined_call_operand.vmem [shape: f32[9,128], index: 0, kind: input, shape index: {}]   ;;  %s653_s3 = inlined_call_operand.vmem [shape: f32[32,128], index: 3, kind: input, shape index: {}]   ;;  %s654_s6 = inlined_call_operand.vmem [shape: f32[8,128], index: 6, kind: output, shape index: {1}]   ;;  %s655_s5 = inlined_call_operand.vmem [shape: f32[8,128], index: 5, kind: output, shape index: {0}]   ;;  %s656_s4 = inlined_call_operand.vmem [shape: f32[1,128], index: 4, kind: input, shape index: {}]   ;;  %s657_s7 = inlined_call_operand.vmem [shape: f32[1,128], index: 7, kind: output, shape index: {2}]  }
   0x1   :  { %v34_v1 = vld [vmem:[%s651_s2] sm:$0x1]  ;;  %30 = vst.msk [vmem:[#allocation2 + $0x8] sm:$0x1] %vm29_vm0, %v559_v3  ;;  %537 = vmatprep.subr.mxu1 %v559_v3  ;;  %v32_v12 = vld [vmem:[%s652_s0 + $0x8] sm:$0x1] }
   0x2   :  { %v31_v2 = vld [vmem:[%s652_s0] sm:$0xff]  ;;  %v36_v4 = vshrl.u32 %v35_v0, 7  ;;  %v46_v5 = vadd.s32 8, %v34_v1  ;;  %vm27_vm12 = vcmask 138240   ;;  %v164_v22 = vld [vmem:[%s653_s3 + $0x8] sm:$0xff]  ;;  %vm561_vm13 = vmmov 0  }
   0x3   :  { %534 = vmatprep.mubr.f32.mxu0 %v31_v2  ;;  %v507_v6 = vld [vmem:[%s650_s1] ss:$0 sm:$0xff]  ;;  %28 = vst.msk [vmem:[#allocation2] sm:$0xff] %vm27_vm12, %v559_v3  ;;  %539 = vmatprep.mubr.msk.f32.mxu1 %vm561_vm13, %v559_v3  ;;  %s562_s0 = smov 120   ;;  %vm203_vm14 = vcmask 64512   ;;  %v165_v28 = vld [vmem:[%s653_s3 + $0x10] sm:$0xff] }
   0x4   :  { %v38_v7 = vadd.s32 16, %v36_v4  ;;  %v49_v8 = vsub.s32 0, %v36_v4  ;;  %v37_v9 = vadd.s32 8, %v36_v4  ;;  %vm43_vm9 = vcmp.eq.s32.totalorder %v36_v4, %v507_v6  ;;  %538 = vmatpush3.msra.mxu1 %v164_v22  ;;  %v166_v30 = vld [vmem:[%s653_s3 + $0x18] sm:$0xff]  ;;  %v384_v37 = vld [vmem:[%s656_s4] sm:$0x1] }
   0x5   :  { %542 = vmatprep.subr.mxu1 %v559_v3 }
   0x6   :  { %vm45_vm1 = vcmp.eq.s32.totalorder %v38_v7, %v507_v6  ;;  %v50_v10 = vrot.slane %v46_v5, %v49_v8  ;;  %vm59_vm2 = vcmp.eq.s32.totalorder %v38_v7, 16  ;;  %vm44_vm4 = vcmp.eq.s32.totalorder %v37_v9, %v507_v6 }
   0x8   :  { %vm53_vm3 = vcmp.eq.s32.totalorder %v38_v7, %v50_v10  ;;  %vm52_vm5 = vcmp.eq.s32.totalorder %v37_v9, %v50_v10  ;;  %vm51_vm10 = vcmp.eq.s32.totalorder %v36_v4, %v50_v10  ;;  %v70_v13 = vld [vmem:[#allocation2 + $0x8] sm:$0x1] }
   0x9   :  { %vm56_vm6 = vmor %vm45_vm1, %vm53_vm3 }
   0xa   :  { %vm62_vm7 = vmor %vm56_vm6, %vm59_vm2  ;;  %v69_v15 = vld [vmem:[#allocation2] sm:$0xff] }
   0xb   :  { %528 = vmatprep.subr.msk.mxu0 %vm62_vm7, %v560_v11  ;;  %vm55_vm8 = vmor %vm44_vm4, %vm52_vm5 }
   0xc   :  { %529 = vmatpush3.xpose.msk.msra.mxu0 %vm62_vm7, %v560_v11  ;;  %vm54_vm11 = vmor %vm43_vm9, %vm51_vm10 }
   0xd   :  { %530 = vmatprep.subr.msk.mxu0 %vm55_vm8, %v560_v11 }
  0x10   :  { %531 = vmatpush3.xpose.msk.msra.mxu0 %vm55_vm8, %v560_v11 }
  0x11   :  { %532 = vmatprep.subr.msk.mxu0 %vm54_vm11, %v560_v11 }
  0x14   :  { %533 = vmatpush3.xpose.msk.msra.mxu0 %vm54_vm11, %v560_v11 }
  0x17   :  { %535 = vmatmul.mubr.f32.vlgmr.msra.gmra.mxu0 %v32_v12 }
  0xd7   :  { %v536_v14 = vpop.f32.mrf.mxu0 }
  0xd8   :  { %v147_v16 = vadd.f32 %v536_v14, %v70_v13 }
  0xd9   :  { %v137_v17 = vpop.f32.mrf.mxu0 }
  0xda   :  { %151 = vst.msk [vmem:[#allocation2 + $0x8] sm:$0x1] %vm29_vm0, %v147_v16  ;;  %v146_v18 = vadd.f32 %v137_v17, %v69_v15 }
  0xdc   :  { %149 = vst.msk [vmem:[#allocation2] sm:$0xff] %vm27_vm12, %v146_v18 }
  0xe1   :  { %v156_v19 = vld [vmem:[#allocation2 + $0x8] sm:$0x1] }
  0xe2   :  { %v157_v20 = vmax.f32 %v156_v19, 1.0 }
  0xe3   :  { %v155_v24 = vld [vmem:[#allocation2] sm:$0xff] }
  0xe4   :  { %v161_v21 = vrot.slane %v157_v20, %v49_v8 }
  0xe6   :  { %557 = vrcp.f32 %v161_v21 }
  0xf3   :  { %v558_v23 = vpop.eup %557 }
  0xf4   :  { %v163_v25 = vmul.f32 %v558_v23, %v155_v24 }
  0xf6   :  { %168 = vrot.lane.b32.xlu0 %v163_v25, %s562_s0 }
  0xfa   :  { %385 = vrot.lane.b32.xlu0 %v163_v25, %s563_s9 }
 0x168   :  { %v169_v26 = vpop.permute.xlu0 %168 }
 0x169   :  { %171 = vxpose.xlu1.b32.start.end [1/1] (short) (narrow) %v169_v26, 8 }
 0x16c   :  { %v386_v27 = vpop.permute.xlu0 %385 }
 0x16d   :  { %278 = vxpose.xlu1.b32.start.end [1/1] (short) (narrow) %v163_v25, 8  ;;  %388 = vxpose.xlu0.b32.start.end [1/1] (short) (narrow) %v386_v27, 8 }
 0x1e5   :  { %v187_v29 = vpop.trf.xlu1 }
 0x1e6   :  { %540 = vmatmul.mubr.msk.f32.vlgmr.msra.gmra.mxu1 %vm203_vm14, %v187_v29 }
 0x1e7   :  { %543 = vmatpush3.msra.mxu1 %v165_v28  ;;  %544 = vmatprep.mubr.msk.f32.mxu1 %vm561_vm13, %v559_v3 }
 0x1e8   :  { %547 = vmatprep.subr.mxu1 %v559_v3 }
 0x1e9   :  { %v294_v31 = vpop.trf.xlu1  ;;  %v404_v32 = vpop.trf.xlu0 }
 0x1ea   :  { %545 = vmatmul.mubr.msk.f32.vlgmr.msra.gmra.mxu1 %vm203_vm14, %v294_v31 }
 0x1eb   :  { %548 = vmatpush3.msra.mxu1 %v166_v30  ;;  %549 = vmatprep.mubr.msk.f32.mxu1 %vm561_vm13, %v559_v3 }
 0x1ee   :  { %550 = vmatmul.mubr.msk.f32.vlgmr.msra.gmra.mxu1 %vm203_vm14, %v404_v32 }
 0x2a6   :  { %v273_v33 = vpop.f32.mrf.mxu1 }
 0x2a7   :  { %277 = vst [vmem:[%s654_s6] sm:$0xff] %v273_v33 }
 0x2a8   :  { %v541_v34 = vpop.f32.mrf.mxu1 }
 0x2aa   :  { %v379_v35 = vpop.f32.mrf.mxu1 }
 0x2ab   :  { %383 = vst [vmem:[%s655_s5] sm:$0xff] %v379_v35 }
 0x2ac   :  { %v546_v36 = vpop.f32.mrf.mxu1 }
 0x2ae   :  { %v489_v38 = vpop.f32.mrf.mxu1 }
 0x2af   :  { %v493_v39 = vadd.f32 %v489_v38, %v384_v37 }
 0x2b0   :  { %v551_v40 = vpop.f32.mrf.mxu1 }
 0x2b1   :  { %494 = vst [vmem:[%s657_s7] sm:$0x1] %v493_v39 }

</bundles_post_ra>
